<compile_context>
chip_gen: v7x
topology: tpu7x:2x2x1
jax: 0.10.0
libtpu: 0.0.40
codegen_flags: <defaults>
</compile_context>

<pallas_src>
import functools

import jax
import jax.numpy as jnp
from jax.experimental import pallas as pl
from jax.experimental.pallas import tpu as pltpu


# ----------------------------------------------------------------------------
# Pallas kernels
# ----------------------------------------------------------------------------

def _sage_kernel(hrow_ref, hall_ref, a_ref, ws_ref, wn_ref, b_ref, o_ref):
    """One SAGEConv('mean') layer on a row tile:
         h_out = relu(h_row @ W_self + (A_row @ h_all) @ W_neigh + b)
       MXU operands bf16, f32 accumulation, elementwise f32."""
    f32, bf16 = jnp.float32, jnp.bfloat16
    agg = jnp.dot(a_ref[...], hall_ref[...], preferred_element_type=f32).astype(bf16)
    acc = jnp.dot(hrow_ref[...], ws_ref[...], preferred_element_type=f32)
    acc = acc + jnp.dot(agg, wn_ref[...], preferred_element_type=f32)
    o_ref[...] = jnp.maximum(acc + b_ref[...], 0.0).astype(o_ref.dtype)


def _sage_np_kernel(hrow_ref, hall_ref, a_ref, ws_ref, wn_ref, b_ref,
                    wnp_ref, bnp_ref, o_ref):
    """SAGE layer 2 with the per-node `nodeprocess` Linear+ReLU folded in:
         hp = relu(relu(SAGE2(h)) @ Wnp + bnp)   (computed once per node, not per edge)."""
    f32, bf16 = jnp.float32, jnp.bfloat16
    agg = jnp.dot(a_ref[...], hall_ref[...], preferred_element_type=f32).astype(bf16)
    acc = jnp.dot(hrow_ref[...], ws_ref[...], preferred_element_type=f32)
    acc = acc + jnp.dot(agg, wn_ref[...], preferred_element_type=f32)
    h2 = jnp.maximum(acc + b_ref[...], 0.0).astype(bf16)
    hp = jnp.maximum(jnp.dot(h2, wnp_ref[...], preferred_element_type=f32)
                     + bnp_ref[...], 0.0)
    o_ref[...] = hp.astype(o_ref.dtype)


def _edge_head_kernel(ef_ref, wcat_ref, be1_ref, we2_ref, be2_ref,
                      bl1_ref, wl2_ref, bl2_ref, o_ref, *, hidden):
    """Per edge tile, everything transposed so edges lie along lanes:
         comb  = [we1|wl1]^T @ ef^T                    one wide MXU GEMM, [2H, t] f32
         gate  = sigmoid(sum_h(tanh(comb[:H] + be1) * we2) + be2)       VPU + sublane reduce
         tfeat = relu(gate * comb[H:] + bl1)           == relu(lin1(ef * gate)); dropout = id
         out   = sum_h(tfeat * wl2) + bl2              lane-dense (1, t) row, unmasked stores
    """
    f32 = jnp.float32
    comb = jnp.dot(wcat_ref[...], ef_ref[...], preferred_element_type=f32)   # [2H, t]
    z = jnp.tanh(comb[:hidden, :] + be1_ref[...])                            # [H, t]
    gate = jax.nn.sigmoid(
        jnp.sum(z * we2_ref[...], axis=0, keepdims=True) + be2_ref[...])     # [1, t]
    tfeat = jnp.maximum(gate * comb[hidden:, :] + bl1_ref[...], 0.0)         # [H, t]
    o_ref[...] = (jnp.sum(tfeat * wl2_ref[...], axis=0, keepdims=True)
                  + bl2_ref[...])                                            # [1, t]


# ----------------------------------------------------------------------------
# Wrappers (glue)
# ----------------------------------------------------------------------------

def _round_up(x, m):
    return (x + m - 1) // m * m


def _vmem_limit_bytes():
    """Per-generation VMEM limit: ~3/4 of physical, capped at 100 MiB
    (~48 MiB on v7x's 64 MiB, ~96 MiB on v5e/v6e's 128 MiB)."""
    cap = 128 * 1024 * 1024
    try:
        cap = int(getattr(pltpu.get_tpu_info(), "vmem_capacity_bytes", cap))
    except Exception:
        pass
    return min(cap * 3 // 4, 100 * 1024 * 1024)


def build_mean_adjacency(src, dst, num_nodes):
    """Dense row-normalized adjacency realizing DGL 'mean' aggregation (zero rows for
    zero-in-degree nodes, matching DGL's zero fill)."""
    # TODO(synk): for non-toy graphs replace the dense N x N A_norm with a scalar-prefetched
    # sparse segment-mean aggregation (CSR row offsets) -- dense is HBM-bound and exceeds
    # VMEM around N~5.7k on v7x.
    a = jnp.zeros((num_nodes, num_nodes), jnp.float32).at[dst, src].add(1.0)
    deg = jnp.sum(a, axis=1, keepdims=True)
    return a / jnp.maximum(deg, 1.0)


def node_embed(x, a_norm, p, *, tile_n=512):
    """hp = relu(nodeprocess(relu(SAGE2(relu(SAGE1(x)))))) -> [N, H] bf16.
    Row-tiled: grid over node-row tiles, A_norm row blocks pipelined, h resident."""
    N, F = x.shape
    H = p["w1_self"].shape[1]
    bf16 = jnp.bfloat16
    vmem = _vmem_limit_bytes()

    tm = min(tile_n, _round_up(N, 8))
    n_pad = _round_up(N, tm)
    pad = n_pad - N
    xb = jnp.pad(x, ((0, pad), (0, 0))).astype(bf16)
    ab = jnp.pad(a_norm, ((0, pad), (0, pad))).astype(bf16)

    def const(shape):
        return pl.BlockSpec(shape, lambda i: (0, 0))

    h1 = pl.pallas_call(
        _sage_kernel,
        out_shape=jax.ShapeDtypeStruct((n_pad, H), bf16),
        grid=(n_pad // tm,),
        in_specs=[pl.BlockSpec((tm, F), lambda i: (i, 0)),       # x row tile (self term)
                  const((n_pad, F)),                             # x resident (aggregation)
                  pl.BlockSpec((tm, n_pad), lambda i: (i, 0)),   # A row tile
                  const((F, H)), const((F, H)), const((1, H))],
        out_specs=pl.BlockSpec((tm, H), lambda i: (i, 0)),
        compiler_params=pltpu.CompilerParams(
            dimension_semantics=("parallel",), vmem_limit_bytes=vmem),
    )(xb, xb, ab,
      p["w1_self"].astype(bf16), p["w1_neigh"].astype(bf16), p["b1"])

    hp = pl.pallas_call(
        _sage_np_kernel,
        out_shape=jax.ShapeDtypeStruct((n_pad, H), bf16),
        grid=(n_pad // tm,),
        in_specs=[pl.BlockSpec((tm, H), lambda i: (i, 0)),
                  const((n_pad, H)),
                  pl.BlockSpec((tm, n_pad), lambda i: (i, 0)),
                  const((H, H)), const((H, H)), const((1, H)),
                  const((H, H)), const((1, H))],
        out_specs=pl.BlockSpec((tm, H), lambda i: (i, 0)),
        compiler_params=pltpu.CompilerParams(
            dimension_semantics=("parallel",), vmem_limit_bytes=vmem),
    )(h1, h1, ab,
      p["w2_self"].astype(bf16), p["w2_neigh"].astype(bf16), p["b2"],
      p["wnp"].astype(bf16), p["bnp"])
    return hp[:N]


def edge_head(ef, p, *, tile_e=2048):
    """ef: [E, 2H+Fe]. Returns [E, 1] f32. Computed transposed (edges along lanes) so the
    output is produced lane-major and stored as dense (1, t) rows."""
    E, K = ef.shape
    H = p["we1"].shape[1]
    C = p["wl2"].shape[1]
    assert C == 1, "Pallas edge head specialized for num_classes=1 (module default)"
    f32, bf16 = jnp.float32, jnp.bfloat16

    t = min(tile_e, _round_up(E, 128))           # lanes per tile, multiple of 128
    e_pad = _round_up(E, t)
    ef_t = jnp.pad(ef, ((0, e_pad - E), (0, 0))).T.astype(bf16)          # [K, e_pad]

    # Fuse we1 | wl1 into one [2H, K] operand -> single wide GEMM per tile.
    w_cat_t = jnp.concatenate([p["we1"], p["wl1"]], axis=1).T.astype(bf16)
    be1 = p["be1"].reshape(H, 1).astype(f32)
    bl1 = p["bl1"].reshape(H, 1).astype(f32)
    we2 = p["we2"].reshape(H, 1).astype(f32)
    wl2 = p["wl2"].reshape(H, 1).astype(f32)
    be2 = p["be2"].reshape(1, 1).astype(f32)
    bl2 = p["bl2"].reshape(1, 1).astype(f32)

    def const(shape):
        return pl.BlockSpec(shape, lambda i: (0, 0))

    out = pl.pallas_call(
        functools.partial(_edge_head_kernel, hidden=H),
        out_shape=jax.ShapeDtypeStruct((1, e_pad), f32),
        grid=(e_pad // t,),
        in_specs=[pl.BlockSpec((K, t), lambda i: (0, i)),   # ef^T tile, one contiguous DMA
                  const((2 * H, K)),                        # [we1|wl1]^T, resident
                  const((H, 1)), const((H, 1)), const((1, 1)),
                  const((H, 1)), const((H, 1)), const((1, 1))],
        out_specs=pl.BlockSpec((1, t), lambda i: (0, i)),   # lane-dense output row
        compiler_params=pltpu.CompilerParams(
            dimension_semantics=("parallel",),
            vmem_limit_bytes=_vmem_limit_bytes()),
    )(ef_t, w_cat_t, be1, we2, be2, bl1, wl2, bl2)
    return out[0, :E][:, None]


def edge_classifier_forward(params, x, src, dst, e_feat):
    n = x.shape[0]
    a_norm = build_mean_adjacency(src, dst, n)             # glue
    hp = node_embed(x, a_norm, params)                     # [N, H] bf16 (nodeprocess folded)
    # TODO(synk): fuse the hp[src]/hp[dst] gather into the edge kernel (resident hp VMEM
    # operand + scalar-prefetched src/dst) to remove this XLA gather + HBM round trip.
    ef = jnp.concatenate([hp[src], hp[dst], e_feat.astype(hp.dtype)], axis=1)
    return edge_head(ef, params)


# ----------------------------------------------------------------------------
# Pure-JAX reference (f32 ground truth for a sanity check)
# ----------------------------------------------------------------------------

def reference_forward(params, x, src, dst, e_feat):
    a_norm = build_mean_adjacency(src, dst, x.shape[0])

    def sage(z, ws, wn, b):
        return jax.nn.relu(z @ ws + (a_norm @ z) @ wn + b)

    h = sage(x, params["w1_self"], params["w1_neigh"], params["b1"])
    h = sage(h, params["w2_self"], params["w2_neigh"], params["b2"])
    hs = jax.nn.relu(h[src] @ params["wnp"] + params["bnp"])
    hd = jax.nn.relu(h[dst] @ params["wnp"] + params["bnp"])
    ef = jnp.concatenate([hs, hd, e_feat], axis=1)
    w = jax.nn.sigmoid(jnp.tanh(ef @ params["we1"] + params["be1"]) @ params["we2"]
                       + params["be2"])
    t = jax.nn.relu((ef * w) @ params["wl1"] + params["bl1"])
    return t @ params["wl2"] + params["bl2"]


# ----------------------------------------------------------------------------
# Main
# ----------------------------------------------------------------------------

if __name__ == "__main__":
    # small, self-consistent shapes (num_node_features must equal hidden_channels)
    N_NODES = 16
    N_EDGES = 24
    NODE_F = 32        # num_node_features
    HIDDEN = 32        # hidden_channels
    EDGE_F = 5         # num_edge_features: weight, dx, dy, dz, dE
    CLASSES = 1        # num_classes

    key = jax.random.PRNGKey(0)
    keys = jax.random.split(key, 20)

    def w_init(k, shape, scale=0.1):
        return (scale * jax.random.normal(k, shape)).astype(jnp.float32)

    params = {
        # SAGEConv(NODE_F -> HIDDEN): fc_self, fc_neigh + output bias
        "w1_self": w_init(keys[0], (NODE_F, HIDDEN)),
        "w1_neigh": w_init(keys[1], (NODE_F, HIDDEN)),
        "b1": w_init(keys[2], (1, HIDDEN)),
        # SAGEConv(HIDDEN -> HIDDEN)
        "w2_self": w_init(keys[3], (HIDDEN, HIDDEN)),
        "w2_neigh": w_init(keys[4], (HIDDEN, HIDDEN)),
        "b2": w_init(keys[5], (1, HIDDEN)),
        # nodeprocess: Linear(NODE_F(=HIDDEN), HIDDEN)
        "wnp": w_init(keys[6], (NODE_F, HIDDEN)),
        "bnp": w_init(keys[7], (1, HIDDEN)),
        # edgeprocess: Linear(2H+Fe, H) -> Tanh -> Linear(H, 1)
        "we1": w_init(keys[8], (2 * HIDDEN + EDGE_F, HIDDEN)),
        "be1": w_init(keys[9], (1, HIDDEN)),
        "we2": w_init(keys[10], (HIDDEN, 1)),
        "be2": w_init(keys[11], (1, 1)),
        # lin1: Linear(2H+Fe, H), lin2: Linear(H, CLASSES)
        "wl1": w_init(keys[12], (2 * HIDDEN + EDGE_F, HIDDEN)),
        "bl1": w_init(keys[13], (1, HIDDEN)),
        "wl2": w_init(keys[14], (HIDDEN, CLASSES)),
        "bl2": w_init(keys[15], (1, CLASSES)),
    }

    # deterministic synthetic graph
    x = jax.random.normal(keys[16], (N_NODES, NODE_F), jnp.float32)        # g.ndata['feat']
    e_feat = jax.random.normal(keys[17], (N_EDGES, EDGE_F), jnp.float32)   # 5 edge feats
    src = jax.random.randint(keys[18], (N_EDGES,), 0, N_NODES, jnp.int32)
    dst = jax.random.randint(keys[19], (N_EDGES,), 0, N_NODES, jnp.int32)

    out = edge_classifier_forward(params, x, src, dst, e_feat)
    out = jax.block_until_ready(out)

    ref = reference_forward(params, x, src, dst, e_feat)
    assert out.shape == (N_EDGES, CLASSES)
    # bf16 MXU operands (f32 accumulation) -> slightly looser tolerance than pure-f32.
    assert jnp.allclose(out, ref, rtol=2e-2, atol=2e-2), (
        f"mismatch: max abs err = {jnp.max(jnp.abs(out - ref))}")

    print("KERNEL_OK")
</pallas_src>

<mosaic_0001>
module attributes {stable_mosaic.version = 11 : i64} {
  func.func @_sage_kernel(%arg0: i32, %arg1: memref<16x32xbf16, #tpu.memory_space<vmem>>, %arg2: memref<16x32xbf16, #tpu.memory_space<vmem>>, %arg3: memref<16x16xbf16, #tpu.memory_space<vmem>>, %arg4: memref<32x32xbf16, #tpu.memory_space<vmem>>, %arg5: memref<32x32xbf16, #tpu.memory_space<vmem>>, %arg6: memref<1x32xf32, #tpu.memory_space<vmem>>, %arg7: memref<16x32xbf16, #tpu.memory_space<vmem>>) attributes {dimension_semantics = [#tpu.dimension_semantics<parallel>], iteration_bounds = array<i64: 1>, scalar_prefetch = 0 : i64, scratch_operands = 0 : i64, tpu.core_type = #tpu.core_type<tc>, window_params = [{transform_indices = @transform_0, window_bounds = array<i64: 16, 32>}, {pipeline_mode = #tpu.pipeline_mode<synchronous>, transform_indices = @transform_1, window_bounds = array<i64: 16, 32>}, {transform_indices = @transform_2, window_bounds = array<i64: 16, 16>}, {pipeline_mode = #tpu.pipeline_mode<synchronous>, transform_indices = @transform_3, window_bounds = array<i64: 32, 32>}, {pipeline_mode = #tpu.pipeline_mode<synchronous>, transform_indices = @transform_4, window_bounds = array<i64: 32, 32>}, {pipeline_mode = #tpu.pipeline_mode<synchronous>, transform_indices = @transform_5, window_bounds = array<i64: 1, 32>}, {transform_indices = @transform_6, window_bounds = array<i64: 16, 32>}]} {
    %c0 = arith.constant 0 : index
    %c0_0 = arith.constant 0 : index
    %0 = vector.load %arg3[%c0, %c0_0] : memref<16x16xbf16, #tpu.memory_space<vmem>>, vector<16x16xbf16>
    %c0_1 = arith.constant 0 : index
    %c0_2 = arith.constant 0 : index
    %1 = vector.load %arg2[%c0_1, %c0_2] : memref<16x32xbf16, #tpu.memory_space<vmem>>, vector<16x32xbf16>
    %cst = arith.constant dense<0.000000e+00> : vector<16x32xf32>
    %2 = tpu.matmul %0, %1, %cst {dimension_numbers = #tpu.dot_dimension_numbers<[1], [0], [0], [1], [0, 0, 1, 1], [], []>} : vector<16x16xbf16>, vector<16x32xbf16>, vector<16x32xf32> -> vector<16x32xf32>
    %3 = arith.truncf %2 : vector<16x32xf32> to vector<16x32xbf16>
    %c0_3 = arith.constant 0 : index
    %c0_4 = arith.constant 0 : index
    %4 = vector.load %arg1[%c0_3, %c0_4] : memref<16x32xbf16, #tpu.memory_space<vmem>>, vector<16x32xbf16>
    %c0_5 = arith.constant 0 : index
    %c0_6 = arith.constant 0 : index
    %5 = vector.load %arg4[%c0_5, %c0_6] : memref<32x32xbf16, #tpu.memory_space<vmem>>, vector<32x32xbf16>
    %cst_7 = arith.constant dense<0.000000e+00> : vector<16x32xf32>
    %6 = tpu.matmul %4, %5, %cst_7 {dimension_numbers = #tpu.dot_dimension_numbers<[1], [0], [0], [1], [0, 0, 1, 1], [], []>} : vector<16x32xbf16>, vector<32x32xbf16>, vector<16x32xf32> -> vector<16x32xf32>
    %c0_8 = arith.constant 0 : index
    %c0_9 = arith.constant 0 : index
    %7 = vector.load %arg5[%c0_8, %c0_9] : memref<32x32xbf16, #tpu.memory_space<vmem>>, vector<32x32xbf16>
    %cst_10 = arith.constant dense<0.000000e+00> : vector<16x32xf32>
    %8 = tpu.matmul %3, %7, %cst_10 {dimension_numbers = #tpu.dot_dimension_numbers<[1], [0], [0], [1], [0, 0, 1, 1], [], []>} : vector<16x32xbf16>, vector<32x32xbf16>, vector<16x32xf32> -> vector<16x32xf32>
    %9 = arith.addf %6, %8 : vector<16x32xf32>
    %c0_11 = arith.constant 0 : index
    %c0_12 = arith.constant 0 : index
    %10 = vector.load %arg6[%c0_11, %c0_12] : memref<1x32xf32, #tpu.memory_space<vmem>>, vector<1x32xf32>
    %11 = vector.broadcast %10 : vector<1x32xf32> to vector<16x32xf32>
    %12 = arith.addf %9, %11 : vector<16x32xf32>
    %cst_13 = arith.constant 0.000000e+00 : f32
    %13 = vector.broadcast %cst_13 : f32 to vector<16x32xf32>
    %14 = arith.maximumf %12, %13 : vector<16x32xf32>
    %15 = arith.truncf %14 : vector<16x32xf32> to vector<16x32xbf16>
    %c0_14 = arith.constant 0 : index
    %c0_15 = arith.constant 0 : index
    %16 = vector.load %arg7[%c0_14, %c0_15] : memref<16x32xbf16, #tpu.memory_space<vmem>>, vector<16x32xbf16>
    tpu.vector_store %arg7[%c0_14, %c0_15], %15 {strides = array<i32>} : memref<16x32xbf16, #tpu.memory_space<vmem>>, vector<16x32xbf16>,
    return
  }
  func.func @transform_0(%arg0: i32) -> (i32, i32) {
    %c0_i32 = arith.constant 0 : i32
    %c0_i32_0 = arith.constant 0 : i32
    return %arg0, %c0_i32 : i32, i32
  }
  func.func @transform_1(%arg0: i32) -> (i32, i32) {
    %c0_i32 = arith.constant 0 : i32
    %c0_i32_0 = arith.constant 0 : i32
    %c0_i32_1 = arith.constant 0 : i32
    return %c0_i32, %c0_i32_0 : i32, i32
  }
  func.func @transform_2(%arg0: i32) -> (i32, i32) {
    %c0_i32 = arith.constant 0 : i32
    %c0_i32_0 = arith.constant 0 : i32
    return %arg0, %c0_i32 : i32, i32
  }
  func.func @transform_3(%arg0: i32) -> (i32, i32) {
    %c0_i32 = arith.constant 0 : i32
    %c0_i32_0 = arith.constant 0 : i32
    %c0_i32_1 = arith.constant 0 : i32
    return %c0_i32, %c0_i32_0 : i32, i32
  }
  func.func @transform_4(%arg0: i32) -> (i32, i32) {
    %c0_i32 = arith.constant 0 : i32
    %c0_i32_0 = arith.constant 0 : i32
    %c0_i32_1 = arith.constant 0 : i32
    return %c0_i32, %c0_i32_0 : i32, i32
  }
  func.func @transform_5(%arg0: i32) -> (i32, i32) {
    %c0_i32 = arith.constant 0 : i32
    %c0_i32_0 = arith.constant 0 : i32
    %c0_i32_1 = arith.constant 0 : i32
    return %c0_i32, %c0_i32_0 : i32, i32
  }
  func.func @transform_6(%arg0: i32) -> (i32, i32) {
    %c0_i32 = arith.constant 0 : i32
    %c0_i32_0 = arith.constant 0 : i32
    return %arg0, %c0_i32 : i32, i32
  }
}

</mosaic_0001>

<bundles_post_ra>
// kernel: tpu_custom_call.1
= control target key start
LH: loop header
LB: loop body
LE: loop exit
PB: predicated region body
PF: predicated region fallthrough
CT: control target
= control target key end

     0   :  { %11 = vsyncpa [#allocation3], 0  ;;  %s728_s0 = inlined_call_operand.hbm [shape: bf16[16,32], index: 0, kind: input, shape index: {}]   ;;  %s729_s1 = inlined_call_operand.hbm [shape: bf16[16,32], index: 1, kind: input, shape index: {}]   ;;  %s730_s2 = inlined_call_operand.hbm [shape: bf16[16,16], index: 2, kind: input, shape index: {}]   ;;  %s731_s3 = inlined_call_operand.hbm [shape: bf16[32,32], index: 3, kind: input, shape index: {}]   ;;  %s732_s4 = inlined_call_operand.hbm [shape: bf16[32,32], index: 4, kind: input, shape index: {}]   ;;  %s733_s5 = inlined_call_operand.hbm [shape: f32[1,32], index: 5, kind: input, shape index: {}]   ;;  %s734_s6 = inlined_call_operand.hbm [shape: bf16[16,32], index: 6, kind: output, shape index: {}]  }
   0x1   :  { %12 = vsyncpa [#allocation6], 0 }
   0x2   :  { %13 = vsyncpa [#allocation9], 0 }
   0x3   :  { %14 = vsyncpa [#allocation12], 0 }
   0x4   :  { %15 = vsyncpa [#allocation4], 0  ;;  %s563_s21 = smov [#allocation5]   ;;  %s564_s23 = smov [#allocation8]  }
   0x5   :  { %s33_s22 = sshll.u32 %s563_s21, 4  ;;  %s57_s24 = sshll.u32 %s564_s23, 4  ;;  %s34_s22 = int_to_ptr.vmem [resolvable:$true] %s33_s22  ;;  %s609_s24 = int_to_ptr.vmem [resolvable:$true] %s57_s24 }
   0x6   :  { %s399_s27 = scalar_lea.hbm %s729_s1, 128 }
   0x7   :  { %p400_p0 = scmp.ne.s32.totalorder %s729_s1, %s399_s27  ;;  %p403_p1 = scmp.lt.u32.totalorder %s399_s27, %s729_s1 }
   0x9   :  { %p405_p2 = pnand %p403_p1, %p400_p0 }
   0xb   :  { %408 = shalt.err (!%p405_p2)
}
   0xc   :  { %s409_s8 = scalar_lea.vmem %s34_s22, 128  ;;  %p414_p4 = scmp.lt.s32.totalorder %s34_s22, %s34_s22 }
   0xd   :  { %p410_p3 = scmp.ne.s32.totalorder %s34_s22, %s409_s8  ;;  %p415_p5 = scmp.lt.s32.totalorder %s409_s8, %s409_s8 }
   0xf   :  { %p416_p6 = por %p415_p5, %p414_p4 }
  0x11   :  { %p417_p7 = pnand %p416_p6, %p410_p3 }
  0x13   :  { %420 = shalt.err (!%p417_p7)
}
  0x14   :  { %s565_s9 = smov 64   ;;  %s566_s10 = smov 4  }
  0x15   :  { %39 = dma.hbm_to_vmem [thread:$0]  %s729_s1, 128, %s34_s22, [#allocation6], %s565_s9, %s565_s9, %s566_s10  }
  0x16   :  { %s421_s15 = scalar_lea.hbm %s731_s3, 256 }
  0x17   :  { %p422_p8 = scmp.ne.s32.totalorder %s731_s3, %s421_s15  ;;  %p425_p9 = scmp.lt.u32.totalorder %s421_s15, %s731_s3 }
  0x19   :  { %p427_p10 = pnand %p425_p9, %p422_p8 }
  0x1b   :  { %430 = shalt.err (!%p427_p10)
}
  0x1c   :  { %s431_s20 = scalar_lea.vmem %s609_s24, 256  ;;  %p436_p12 = scmp.lt.s32.totalorder %s609_s24, %s609_s24 }
  0x1d   :  { %p432_p11 = scmp.ne.s32.totalorder %s609_s24, %s431_s20  ;;  %p437_p13 = scmp.lt.s32.totalorder %s431_s20, %s431_s20 }
  0x1f   :  { %p438_p0 = por %p437_p13, %p436_p12 }
  0x21   :  { %p439_p1 = pnand %p438_p0, %p432_p11 }
  0x23   :  { %442 = shalt.err (!%p439_p1)
}
  0x24   :  { %63 = dma.hbm_to_vmem [thread:$0]  %s731_s3, 256, %s609_s24, [#allocation9], %s565_s9, %s565_s9, %s566_s10  }
  0x25   :  { %s567_s22 = smov [#allocation2]   ;;  %s568_s25 = smov [#allocation7]  }
  0x26   :  { %s21_s23 = sshll.u32 %s567_s22, 4  ;;  %s45_s26 = sshll.u32 %s568_s25, 4  ;;  %s22_s23 = int_to_ptr.vmem [resolvable:$true] %s21_s23  ;;  %s646_s26 = int_to_ptr.vmem [resolvable:$true] %s45_s26 }
  0x27   :  { %s443_s29 = scalar_lea.hbm %s728_s0, 128 }
  0x28   :  { %p444_p2 = scmp.ne.s32.totalorder %s728_s0, %s443_s29  ;;  %p447_p3 = scmp.lt.u32.totalorder %s443_s29, %s728_s0 }
  0x2a   :  { %p449_p4 = pnand %p447_p3, %p444_p2 }
  0x2c   :  { %452 = shalt.err (!%p449_p4)
}
  0x2d   :  { %s453_s3 = scalar_lea.vmem %s22_s23, 128  ;;  %p458_p6 = scmp.lt.s32.totalorder %s22_s23, %s22_s23 }
  0x2e   :  { %p454_p5 = scmp.ne.s32.totalorder %s22_s23, %s453_s3  ;;  %p459_p7 = scmp.lt.s32.totalorder %s453_s3, %s453_s3 }
  0x30   :  { %p460_p8 = por %p459_p7, %p458_p6 }
  0x32   :  { %p461_p9 = pnand %p460_p8, %p454_p5 }
  0x34   :  { %464 = shalt.err (!%p461_p9)
}
  0x35   :  { %27 = dma.hbm_to_vmem [thread:$0]  %s728_s0, 128, %s22_s23, [#allocation3], %s565_s9, %s565_s9, %s566_s10  }
  0x36   :  { %s465_s15 = scalar_lea.hbm %s730_s2, 128 }
  0x37   :  { %p466_p10 = scmp.ne.s32.totalorder %s730_s2, %s465_s15  ;;  %p469_p11 = scmp.lt.u32.totalorder %s465_s15, %s730_s2 }
  0x39   :  { %p471_p12 = pnand %p469_p11, %p466_p10 }
  0x3b   :  { %474 = shalt.err (!%p471_p12)
}
  0x3c   :  { %s475_s20 = scalar_lea.vmem %s646_s26, 128  ;;  %p480_p0 = scmp.lt.s32.totalorder %s646_s26, %s646_s26 }
  0x3d   :  { %p476_p13 = scmp.ne.s32.totalorder %s646_s26, %s475_s20  ;;  %p481_p1 = scmp.lt.s32.totalorder %s475_s20, %s475_s20 }
  0x3f   :  { %p482_p2 = por %p481_p1, %p480_p0 }
  0x41   :  { %p483_p3 = pnand %p482_p2, %p476_p13 }
  0x43   :  { %486 = shalt.err (!%p483_p3)
}
  0x44   :  { %51 = dma.hbm_to_vmem [thread:$0]  %s730_s2, 128, %s646_s26, [#allocation6], %s565_s9, %s565_s9, %s566_s10  }
  0x45   :  { %s569_s21 = smov [#allocation10]   ;;  %s570_s23 = smov [#allocation11]  }
  0x46   :  { %s69_s22 = sshll.u32 %s569_s21, 4  ;;  %s82_s25 = sshll.u32 %s570_s23, 4  ;;  %s70_s22 = int_to_ptr.vmem [resolvable:$true] %s69_s22  ;;  %s83_s25 = int_to_ptr.vmem [resolvable:$true] %s82_s25 }
  0x47   :  { %s487_s29 = scalar_lea.hbm %s732_s4, 256 }
  0x48   :  { %p488_p4 = scmp.ne.s32.totalorder %s732_s4, %s487_s29  ;;  %p491_p5 = scmp.lt.u32.totalorder %s487_s29, %s732_s4 }
  0x4a   :  { %p493_p6 = pnand %p491_p5, %p488_p4 }
  0x4c   :  { %496 = shalt.err (!%p493_p6)
}
  0x4d   :  { %s497_s2 = scalar_lea.vmem %s70_s22, 256  ;;  %p502_p8 = scmp.lt.s32.totalorder %s70_s22, %s70_s22 }
  0x4e   :  { %p498_p7 = scmp.ne.s32.totalorder %s70_s22, %s497_s2  ;;  %p503_p9 = scmp.lt.s32.totalorder %s497_s2, %s497_s2 }
  0x50   :  { %p504_p10 = por %p503_p9, %p502_p8 }
  0x52   :  { %p505_p11 = pnand %p504_p10, %p498_p7 }
  0x54   :  { %508 = shalt.err (!%p505_p11)
}
  0x55   :  { %75 = dma.hbm_to_vmem [thread:$0]  %s732_s4, 256, %s70_s22, [#allocation9], %s565_s9, %s565_s9, %s566_s10  }
  0x56   :  { %s509_s13 = scalar_lea.hbm %s733_s5, 16 }
  0x57   :  { %p510_p12 = scmp.ne.s32.totalorder %s733_s5, %s509_s13  ;;  %p513_p13 = scmp.lt.u32.totalorder %s509_s13, %s733_s5 }
  0x59   :  { %p515_p0 = pnand %p513_p13, %p510_p12 }
  0x5b   :  { %518 = shalt.err (!%p515_p0)
}
  0x5c   :  { %s519_s18 = scalar_lea.vmem %s83_s25, 16  ;;  %s523_s19 = scalar_lea.vmem %s83_s25, 32 }
  0x5d   :  { %p520_p1 = scmp.ne.s32.totalorder %s83_s25, %s519_s18  ;;  %p524_p2 = scmp.lt.s32.totalorder %s83_s25, %s83_s25 }
  0x5e   :  { %p525_p3 = scmp.lt.s32.totalorder %s523_s19, %s519_s18 }
  0x60   :  { %p526_p4 = por %p525_p3, %p524_p2 }
  0x62   :  { %p527_p5 = pnand %p526_p4, %p520_p1 }
  0x64   :  { %530 = shalt.err (!%p527_p5)
}
  0x65   :  { %85 = dma.hbm_to_vmem [thread:$0]  %s733_s5, 16, %s83_s25, [#allocation12]  }
  0x66   :  { %553 = dma.done.wait [#allocation3], 128  }
  0x67   :  { %554 = vsyncadd [#allocation3], 4294967168 }
  0x68   :  { %555 = dma.done.wait [#allocation6], 256  }
  0x69   :  { %556 = vsyncadd [#allocation6], 4294967040 }
  0x6a   :  { %557 = dma.done.wait [#allocation9], 512  }
  0x6b   :  { %558 = vsyncadd [#allocation9], 4294966784 }
  0x6c   :  { %559 = dma.done.wait [#allocation12], 16  }
  0x6d   :  { %560 = vsyncadd [#allocation12], 4294967280  ;;  %v571_v0 = vmov 0.0   ;;  %vm572_vm0 = vmmov 0   ;;  %v392_v1 = vld [vmem:[#allocation5] sm:$0xff]   ;;  %v393_v2 = vld [vmem:[#allocation7] sm:$0xff]  }
  0x6e   :  { %359 = vmatprep.subr.bf16.mxu0 %v571_v0  ;;  %361 = vmatprep.mubr.msk.bf16.mxu0 %vm572_vm0, %v571_v0  ;;  %vm120_vm1 = vcmask 130048   ;;  %v394_v3 = vld [vmem:[#allocation8] sm:$0xff]   ;;  %v395_v4 = vld [vmem:[#allocation10] sm:$0xff]   ;;  %v396_v5 = vld [vmem:[#allocation8 + $0x8] sm:$0xff]   ;;  %vm188_vm2 = vcmask 261120   ;;  %vm313_vm3 = vcmask 257024  }
  0x6f   :  { %365 = vmatprep.subr.bf16.mxu1 %v571_v0  ;;  %369 = vmatprep.mubr.msk.bf16.mxu1 %vm572_vm0, %v571_v0  ;;  %v397_v6 = vld [vmem:[#allocation10 + $0x8] sm:$0xff]   ;;  %v398_v7 = vld [vmem:[#allocation2] sm:$0xff]   ;;  %v346_v18 = vld [vmem:[#allocation11] ss:$0 sm:$0xff]  ;;  %s573_s5 = smov [#allocation13]  }
  0x70   :  { %360 = vmatpush3.bf16.msra.mxu0 %v392_v1  ;;  %366 = vmatpush3.bf16.msra.mxu1 %v395_v4  ;;  %s321_s0 = sshll.u32 %s573_s5, 4  ;;  %s322_s0 = int_to_ptr.vmem [resolvable:$true] %s321_s0 }
  0x71   :  { %373 = vmatprep.subr.bf16.mxu0 %v571_v0  ;;  %367 = vmatprep.subr.bf16.mxu1 %v571_v0  ;;  %s531_s1 = scalar_lea.vmem %s322_s0, 128  ;;  %p536_p7 = scmp.lt.s32.totalorder %s322_s0, %s322_s0 }
  0x72   :  { %p532_p6 = scmp.ne.s32.totalorder %s322_s0, %s531_s1  ;;  %p537_p8 = scmp.lt.s32.totalorder %s531_s1, %s531_s1 }
  0x73   :  { %362 = vmatmul.mubr.msk.bf16.vlgmr.msra.gmra.mrb[0].mxu0 %vm120_vm1, %v393_v2 }
  0x74   :  { %374 = vmatpush3.bf16.msra.mxu0 %v394_v3  ;;  %377 = vmatprep.mubr.msk.bf16.mxu0 %vm572_vm0, %v571_v0  ;;  %p538_p9 = por %p537_p8, %p536_p7 }
  0x75   :  { %375 = vmatprep.subr.bf16.mxu0 %v571_v0  ;;  %368 = vmatpush3.bf16.msra.mxu1 %v397_v6 }
  0x76   :  { %p539_p10 = pnand %p538_p9, %p532_p6 }
  0x78   :  { %376 = vmatpush3.bf16.msra.mxu0 %v396_v5 }
  0x7b   :  { %378 = vmatmul.mubr.msk.bf16.vlgmr.msra.gmra.mrb[4].mxu0 %vm188_vm2, %v398_v7 }
 0x146   :  { %v158_v8 = vpop.f32.mrb[0].mxu0 }
 0x147   :  { %v363_v9 = vpop.f32.mrb[1].mxu0 }
 0x148   :  { %v161_v10 = vpop.f32.mrb[2].mxu0 }
 0x149   :  { %v165_v11 = vpack.c.bf16 %v161_v10, %v158_v8  ;;  %v364_v12 = vpop.f32.mrb[3].mxu0 }
 0x14b   :  { %370 = vmatmul.mubr.msk.bf16.vlgmr.msra.gmra.mrb[0].mxu1 %vm188_vm2, %v165_v11 }
 0x14e   :  { %v287_v13 = vpop.f32.mrb[4].mxu0 }
 0x14f   :  { %v379_v14 = vpop.f32.mrb[5].mxu0 }
 0x150   :  { %v290_v15 = vpop.f32.mrb[6].mxu0 }
 0x151   :  { %v380_v16 = vpop.f32.mrb[7].mxu0 }
 0x21e   :  { %v226_v17 = vpop.f32.mrb[0].mxu1 }
 0x21f   :  { %v288_v19 = vadd.f32 %v287_v13, %v226_v17  ;;  %v371_v20 = vpop.f32.mrb[1].mxu1 }
 0x220   :  { %v229_v21 = vpop.f32.mrb[2].mxu1 }
 0x221   :  { %v301_v22 = vadd.f32 %v346_v18, %v288_v19  ;;  %v291_v23 = vadd.f32 %v290_v15, %v229_v21  ;;  %v372_v24 = vpop.f32.mrb[3].mxu1 }
 0x223   :  { %v303_v25 = vmax.f32 %v301_v22, 0.0  ;;  %v302_v26 = vadd.f32 %v346_v18, %v291_v23 }
 0x225   :  { %v349_v27 = vpack.c.bf16 %v303_v25, %v303_v25  ;;  %v304_v28 = vmax.f32 %v302_v26, 0.0 }
 0x227   :  { %v350_v29 = vpack.c.bf16 %v304_v28, %v304_v28  ;;  %314 = vst.msk [vmem:[#allocation13] sm:$0xf] %vm313_vm3, %v349_v27 }
 0x229   :  { %315 = vst.msk [vmem:[#allocation13 + $0x4] sm:$0xf] %vm313_vm3, %v350_v29 }
 0x22a   :  { %542 = shalt.err (!%p539_p10)
}
 0x22b   :  { %s543_s23 = scalar_lea.hbm %s734_s6, 128 }
 0x22c   :  { %p544_p11 = scmp.ne.s32.totalorder %s734_s6, %s543_s23  ;;  %p547_p12 = scmp.lt.u32.totalorder %s543_s23, %s734_s6 }
 0x22e   :  { %p549_p13 = pnand %p547_p12, %p544_p11 }
 0x230   :  { %552 = shalt.err (!%p549_p13)
}
 0x231   :  { %327 = dma.vmem_to_hbm [thread:$0]  %s322_s0, 128, %s734_s6, [#allocation4], %s565_s9, %s565_s9, %s566_s10  }
 0x232   :  { %561 = dma.done.wait [#allocation4], 128  }
 0x233   :  { %562 = vsyncadd [#allocation4], 4294967168 }
 0x234   :  { %331 = vsyncpa [#allocation3], 1 }
 0x235   :  { %332 = vsyncpa [#allocation6], 1 }
 0x236   :  { %333 = vsyncpa [#allocation9], 1 }
 0x237   :  { %334 = vsyncpa [#allocation12], 1 }
 0x238   :  { %335 = vsyncpa [#allocation4], 1 }

</bundles_post_ra>
